<compile_context>
chip_gen: v5e
topology: v5e:2x2
jax: 0.10.0
libtpu: 0.0.40
codegen_flags: <defaults>
</compile_context>

<pallas_src>
import functools

import jax
import jax.numpy as jnp
from jax.experimental import pallas as pl
from jax.experimental.pallas import tpu as pltpu

BN_EPS = 1e-5
NUM_LAYERS = 5
OP_PAD = 128  # lane-dense padding for the *output* dim only


# ----------------------------- Pallas kernel --------------------------------

def gin_fused_kernel(adj_ref, h_ref, w1_ref, w2_ref, bias_ref, wp_ref, out_ref,
                     *, hid, num_gin):
    """Whole GIN forward for one graph, VMEM-resident, statically unrolled.

    adj  : (N, N)                    dense adjacency (sum aggregator)
    h    : (N, hid)                  node features, zero-padded to hid lanes
    w1   : (num_gin, hid, hid)       MLP Linear1 with inner BN folded in
    w2   : (num_gin, hid, hid)       MLP Linear2 with outer BN folded in
    bias : (2*num_gin + 1, OP_PAD)   rows [0:num_gin]=b1, [num_gin:2*num_gin]=b2
                                     (first hid lanes), last row = summed head bias
    wp   : (NUM_LAYERS*hid, OP_PAD)  stacked prediction-head weights
    out  : (1, OP_PAD)               summed score over layers (lane-dense store)
    """
    adj = adj_ref[...]
    h = h_ref[...]
    biases = bias_ref[...]

    # Head 0 pools the raw (padded) input features.
    pooled = [jnp.sum(h, axis=0, keepdims=True)]

    for l in range(num_gin):  # statically unrolled
        # GINConv with learn_eps=False (eps = 0): h + sum over neighbors
        agg = h + jnp.dot(adj, h, preferred_element_type=jnp.float32)

        # MLP: Linear1 (+folded inner BN) -> ReLU -> Linear2 (+folded outer BN) -> ReLU
        z = jnp.dot(agg, w1_ref[l], preferred_element_type=jnp.float32)
        z = jnp.maximum(z + biases[l:l + 1, :hid], 0.0)
        z = jnp.dot(z, w2_ref[l], preferred_element_type=jnp.float32)
        h = jnp.maximum(z + biases[num_gin + l:num_gin + l + 1, :hid], 0.0)

        pooled.append(jnp.sum(h, axis=0, keepdims=True))

    # All 5 sum-pool prediction heads as ONE matmul: (1, L*hid) @ (L*hid, OP_PAD).
    pooled_cat = jnp.concatenate(pooled, axis=-1)
    score = jnp.dot(pooled_cat, wp_ref[...], preferred_element_type=jnp.float32)
    out_ref[...] = score + biases[2 * num_gin:, :]   # pre-summed head biases


# ------------------------------ wrappers -------------------------------------

def _fold_bn(w, bn):
    """Fold eval-mode BatchNorm1d into the preceding bias-free Linear.

    w: (din, dout); bn rows = [gamma, beta, running_mean, running_var].
    Returns (w_folded, bias) with  x @ w_folded + bias == BN(x @ w).
    """
    gamma, beta, mean, var = bn[0], bn[1], bn[2], bn[3]
    scale = gamma * jax.lax.rsqrt(var + BN_EPS)
    return w * scale[None, :], beta - mean * scale


def _pad2(x, rows, cols):
    return jnp.pad(x, ((0, rows - x.shape[0]), (0, cols - x.shape[1])))


def prepare_fused_params(params, hidden_dim, output_dim):
    """BN-fold, keep hidden dims unpadded, merge biases, stack head weights along K."""
    hid = hidden_dim
    w1s, w2s, b1s, b2s = [], [], [], []
    for lyr in params["gin_layers"]:
        w1, b1 = _fold_bn(lyr["w1"], lyr["bn_mlp"])
        w2, b2 = _fold_bn(lyr["w2"], lyr["bn_out"])
        w1s.append(_pad2(w1, hid, hid))                # layer 0: (in_dim, hid) -> (hid, hid)
        w2s.append(_pad2(w2, hid, hid))
        b1s.append(jnp.pad(b1, (0, OP_PAD - hid)))
        b2s.append(jnp.pad(b2, (0, OP_PAD - hid)))

    wp_blocks = []
    bp_sum = jnp.zeros((OP_PAD,), jnp.float32)
    for pred in params["pred"]:
        wp_blocks.append(_pad2(pred["w"], hid, OP_PAD))
        bp_sum = bp_sum + jnp.pad(pred["b"][0], (0, OP_PAD - pred["b"].shape[1]))

    return {
        "w1": jnp.stack(w1s),                          # (L-1, hid, hid)
        "w2": jnp.stack(w2s),                          # (L-1, hid, hid)
        "wp": jnp.concatenate(wp_blocks, axis=0),      # (L*hid, OP_PAD)
        "biases": jnp.stack(b1s + b2s + [bp_sum]),     # (2*(L-1)+1, OP_PAD)
    }


@functools.partial(jax.jit, static_argnames=("output_dim",))
def gin_forward(adj, h, fused, output_dim):
    batch, n, d = h.shape
    num_gin, hid, _ = fused["w1"].shape
    op_pad = fused["wp"].shape[-1]
    assert n % 8 == 0, "node count must be a multiple of 8 (sublane axis)"
    # TODO(synk): if N ever needs padding to a multiple of 8, mask padded node rows
    # before pooling and before each adj@h (folded BN bias makes zero rows non-zero).
    h_pad = jnp.pad(h, ((0, 0), (0, 0), (0, hid - d)))

    kernel = functools.partial(gin_fused_kernel, hid=hid, num_gin=num_gin)
    out = pl.pallas_call(
        kernel,
        out_shape=jax.ShapeDtypeStruct((batch, 1, op_pad), jnp.float32),
        grid_spec=pltpu.PrefetchScalarGridSpec(
            num_scalar_prefetch=0,
            grid=(batch,),
            in_specs=[
                # per-graph streams (double-buffered across the parallel grid axis)
                pl.BlockSpec((None, n, n), lambda b: (b, 0, 0)),
                pl.BlockSpec((None, n, hid), lambda b: (b, 0, 0)),
                # weights: constant index maps -> fetched once, stay VMEM-resident
                pl.BlockSpec(fused["w1"].shape, lambda b: (0, 0, 0)),
                pl.BlockSpec(fused["w2"].shape, lambda b: (0, 0, 0)),
                pl.BlockSpec(fused["biases"].shape, lambda b: (0, 0)),
                pl.BlockSpec(fused["wp"].shape, lambda b: (0, 0)),
            ],
            out_specs=pl.BlockSpec((None, 1, op_pad), lambda b: (b, 0, 0)),
        ),
        compiler_params=pltpu.CompilerParams(dimension_semantics=("parallel",)),
    )(adj, h_pad, fused["w1"], fused["w2"], fused["biases"], fused["wp"])
    return out[:, 0, :output_dim]


# --------------------------- pure-JAX reference ------------------------------

def reference_forward(adj, h, params):
    def bn(x, p):
        g, b, m, v = p[0], p[1], p[2], p[3]
        return (x - m) * jax.lax.rsqrt(v + BN_EPS) * g + b

    hidden_rep = [h]
    for lyr in params["gin_layers"]:
        agg = h + adj @ h
        z = jax.nn.relu(bn(agg @ lyr["w1"], lyr["bn_mlp"]))
        z = z @ lyr["w2"]
        h = jax.nn.relu(bn(z, lyr["bn_out"]))
        hidden_rep.append(h)

    score = jnp.zeros((1, params["pred"][0]["w"].shape[1]), jnp.float32)
    for h_i, pred in zip(hidden_rep, params["pred"]):
        score = score + jnp.sum(h_i, axis=0, keepdims=True) @ pred["w"] + pred["b"]
    return score


def reference_batched(adj, h, params):
    return jnp.concatenate(
        [reference_forward(adj[b], h[b], params) for b in range(adj.shape[0])], axis=0)


# --------------------------- parameter setup ---------------------------------

def _bn_pack(key, dim):
    k0, k1, k2, k3 = jax.random.split(key, 4)
    gamma = 1.0 + 0.1 * jax.random.normal(k0, (dim,))
    beta = 0.05 * jax.random.normal(k1, (dim,))
    mean = 0.1 * jax.random.normal(k2, (dim,))
    var = 1.0 + 0.1 * jax.random.uniform(k3, (dim,))
    return jnp.stack([gamma, beta, mean, var]).astype(jnp.float32)


def init_params(key, input_dim, hidden_dim, output_dim, num_layers=NUM_LAYERS):
    n_gin = num_layers - 1
    n_keys = 4 * n_gin + 2 * num_layers
    keys = iter(jax.random.split(key, n_keys))

    params = {"gin_layers": [], "pred": []}
    for layer in range(n_gin):
        din = input_dim if layer == 0 else hidden_dim
        w1 = (jax.random.normal(next(keys), (din, hidden_dim)) /
              jnp.sqrt(din)).astype(jnp.float32)
        w2 = (jax.random.normal(next(keys), (hidden_dim, hidden_dim)) /
              jnp.sqrt(hidden_dim)).astype(jnp.float32)
        params["gin_layers"].append({
            "w1": w1,
            "w2": w2,
            "bn_mlp": _bn_pack(next(keys), hidden_dim),
            "bn_out": _bn_pack(next(keys), hidden_dim),
        })
    for layer in range(num_layers):
        din = input_dim if layer == 0 else hidden_dim
        w = (jax.random.normal(next(keys), (din, output_dim)) /
             jnp.sqrt(din)).astype(jnp.float32)
        b = (0.05 * jax.random.normal(next(keys), (1, output_dim))).astype(jnp.float32)
        params["pred"].append({"w": w, "b": b})
    return params


# -------------------------------- main ----------------------------------------

if __name__ == "__main__":
    key = jax.random.PRNGKey(0)
    k_feat, k_param = jax.random.split(key, 2)

    B = 2             # batch of graphs (parallel grid axis)
    N = 16            # nodes per graph
    input_dim = 8
    hidden_dim = 32
    output_dim = 4

    # Deterministic graphs: graph 0 = undirected ring, graph 1 = ring + length-4 chords.
    idx = jnp.arange(N)
    ring = jnp.zeros((N, N), jnp.float32)
    ring = ring.at[idx, (idx + 1) % N].set(1.0).at[idx, (idx - 1) % N].set(1.0)
    chords = ring.at[idx, (idx + 4) % N].set(1.0).at[idx, (idx - 4) % N].set(1.0)
    adj = jnp.stack([ring, chords])                      # (B, N, N)

    h = jax.random.normal(k_feat, (B, N, input_dim), dtype=jnp.float32)

    params = init_params(k_param, input_dim, hidden_dim, output_dim, NUM_LAYERS)
    fused = prepare_fused_params(params, hidden_dim, output_dim)

    score = gin_forward(adj, h, fused, output_dim)
    jax.block_until_ready(score)
    assert score.shape == (B, output_dim)

    # Correctness check vs. un-fused, un-folded pure-JAX reference.
    ref = reference_batched(adj, h, params)
    assert jnp.allclose(score, ref, rtol=2e-3, atol=2e-3), (score, ref)

    print("KERNEL_OK")
</pallas_src>

<mosaic_0001>
module attributes {stable_mosaic.version = 11 : i64} {
  func.func @gin_fused_kernel(%arg0: i32, %arg1: memref<1x16x16xf32, #tpu.memory_space<vmem>>, %arg2: memref<1x16x32xf32, #tpu.memory_space<vmem>>, %arg3: memref<4x32x32xf32, #tpu.memory_space<vmem>>, %arg4: memref<4x32x32xf32, #tpu.memory_space<vmem>>, %arg5: memref<9x128xf32, #tpu.memory_space<vmem>>, %arg6: memref<160x128xf32, #tpu.memory_space<vmem>>, %arg7: memref<1x1x128xf32, #tpu.memory_space<vmem>>) attributes {dimension_semantics = [#tpu.dimension_semantics<parallel>], iteration_bounds = array<i64: 2>, scalar_prefetch = 0 : i64, scratch_operands = 0 : i64, tpu.core_type = #tpu.core_type<tc>, window_params = [{transform_indices = @transform_0, window_bounds = array<i64: 1, 16, 16>}, {transform_indices = @transform_1, window_bounds = array<i64: 1, 16, 32>}, {pipeline_mode = #tpu.pipeline_mode<synchronous>, transform_indices = @transform_2, window_bounds = array<i64: 4, 32, 32>}, {pipeline_mode = #tpu.pipeline_mode<synchronous>, transform_indices = @transform_3, window_bounds = array<i64: 4, 32, 32>}, {pipeline_mode = #tpu.pipeline_mode<synchronous>, transform_indices = @transform_4, window_bounds = array<i64: 9, 128>}, {pipeline_mode = #tpu.pipeline_mode<synchronous>, transform_indices = @transform_5, window_bounds = array<i64: 160, 128>}, {transform_indices = @transform_6, window_bounds = array<i64: 1, 1, 128>}]} {
    %c0 = arith.constant 0 : index
    %c0_0 = arith.constant 0 : index
    %c0_1 = arith.constant 0 : index
    %0 = vector.load %arg1[%c0, %c0_0, %c0_1] : memref<1x16x16xf32, #tpu.memory_space<vmem>>, vector<1x16x16xf32>
    %1 = vector.shape_cast %0 : vector<1x16x16xf32> to vector<16x16xf32>
    %c0_2 = arith.constant 0 : index
    %c0_3 = arith.constant 0 : index
    %c0_4 = arith.constant 0 : index
    %2 = vector.load %arg2[%c0_2, %c0_3, %c0_4] : memref<1x16x32xf32, #tpu.memory_space<vmem>>, vector<1x16x32xf32>
    %3 = vector.shape_cast %2 : vector<1x16x32xf32> to vector<16x32xf32>
    %c0_5 = arith.constant 0 : index
    %c0_6 = arith.constant 0 : index
    %4 = vector.load %arg5[%c0_5, %c0_6] : memref<9x128xf32, #tpu.memory_space<vmem>>, vector<9x128xf32>
    %cst = arith.constant dense<0.000000e+00> : vector<32xf32>
    %5 = vector.multi_reduction <add>, %3, %cst [0] : vector<16x32xf32> to vector<32xf32>
    %6 = vector.shape_cast %5 : vector<32xf32> to vector<1x32xf32>
    %cst_7 = arith.constant dense<0.000000e+00> : vector<16x32xf32>
    %7 = tpu.matmul %1, %3, %cst_7 {dimension_numbers = #tpu.dot_dimension_numbers<[1], [0], [0], [1], [0, 0, 1, 1], [], []>} : vector<16x16xf32>, vector<16x32xf32>, vector<16x32xf32> -> vector<16x32xf32>
    %8 = arith.addf %3, %7 : vector<16x32xf32>
    %c0_8 = arith.constant 0 : index
    %c0_9 = arith.constant 0 : index
    %c0_10 = arith.constant 0 : index
    %9 = vector.load %arg3[%c0_8, %c0_9, %c0_10] : memref<4x32x32xf32, #tpu.memory_space<vmem>>, vector<1x32x32xf32>
    %10 = vector.shape_cast %9 : vector<1x32x32xf32> to vector<32x32xf32>
    %cst_11 = arith.constant dense<0.000000e+00> : vector<16x32xf32>
    %11 = tpu.matmul %8, %10, %cst_11 {dimension_numbers = #tpu.dot_dimension_numbers<[1], [0], [0], [1], [0, 0, 1, 1], [], []>} : vector<16x32xf32>, vector<32x32xf32>, vector<16x32xf32> -> vector<16x32xf32>
    %12 = vector.extract_strided_slice %4 {offsets = [0, 0], sizes = [1, 32], strides = [1, 1]} : vector<9x128xf32> to vector<1x32xf32>
    %13 = vector.broadcast %12 : vector<1x32xf32> to vector<16x32xf32>
    %14 = arith.addf %11, %13 : vector<16x32xf32>
    %cst_12 = arith.constant 0.000000e+00 : f32
    %15 = vector.broadcast %cst_12 : f32 to vector<16x32xf32>
    %16 = arith.maximumf %14, %15 : vector<16x32xf32>
    %c0_13 = arith.constant 0 : index
    %c0_14 = arith.constant 0 : index
    %c0_15 = arith.constant 0 : index
    %17 = vector.load %arg4[%c0_13, %c0_14, %c0_15] : memref<4x32x32xf32, #tpu.memory_space<vmem>>, vector<1x32x32xf32>
    %18 = vector.shape_cast %17 : vector<1x32x32xf32> to vector<32x32xf32>
    %cst_16 = arith.constant dense<0.000000e+00> : vector<16x32xf32>
    %19 = tpu.matmul %16, %18, %cst_16 {dimension_numbers = #tpu.dot_dimension_numbers<[1], [0], [0], [1], [0, 0, 1, 1], [], []>} : vector<16x32xf32>, vector<32x32xf32>, vector<16x32xf32> -> vector<16x32xf32>
    %20 = vector.extract_strided_slice %4 {offsets = [4, 0], sizes = [1, 32], strides = [1, 1]} : vector<9x128xf32> to vector<1x32xf32>
    %21 = vector.broadcast %20 : vector<1x32xf32> to vector<16x32xf32>
    %22 = arith.addf %19, %21 : vector<16x32xf32>
    %cst_17 = arith.constant 0.000000e+00 : f32
    %23 = vector.broadcast %cst_17 : f32 to vector<16x32xf32>
    %24 = arith.maximumf %22, %23 : vector<16x32xf32>
    %cst_18 = arith.constant dense<0.000000e+00> : vector<32xf32>
    %25 = vector.multi_reduction <add>, %24, %cst_18 [0] : vector<16x32xf32> to vector<32xf32>
    %26 = vector.shape_cast %25 : vector<32xf32> to vector<1x32xf32>
    %cst_19 = arith.constant dense<0.000000e+00> : vector<16x32xf32>
    %27 = tpu.matmul %1, %24, %cst_19 {dimension_numbers = #tpu.dot_dimension_numbers<[1], [0], [0], [1], [0, 0, 1, 1], [], []>} : vector<16x16xf32>, vector<16x32xf32>, vector<16x32xf32> -> vector<16x32xf32>
    %28 = arith.addf %24, %27 : vector<16x32xf32>
    %c1 = arith.constant 1 : index
    %c0_20 = arith.constant 0 : index
    %c0_21 = arith.constant 0 : index
    %29 = vector.load %arg3[%c1, %c0_20, %c0_21] : memref<4x32x32xf32, #tpu.memory_space<vmem>>, vector<1x32x32xf32>
    %30 = vector.shape_cast %29 : vector<1x32x32xf32> to vector<32x32xf32>
    %cst_22 = arith.constant dense<0.000000e+00> : vector<16x32xf32>
    %31 = tpu.matmul %28, %30, %cst_22 {dimension_numbers = #tpu.dot_dimension_numbers<[1], [0], [0], [1], [0, 0, 1, 1], [], []>} : vector<16x32xf32>, vector<32x32xf32>, vector<16x32xf32> -> vector<16x32xf32>
    %32 = vector.extract_strided_slice %4 {offsets = [1, 0], sizes = [1, 32], strides = [1, 1]} : vector<9x128xf32> to vector<1x32xf32>
    %33 = vector.broadcast %32 : vector<1x32xf32> to vector<16x32xf32>
    %34 = arith.addf %31, %33 : vector<16x32xf32>
    %cst_23 = arith.constant 0.000000e+00 : f32
    %35 = vector.broadcast %cst_23 : f32 to vector<16x32xf32>
    %36 = arith.maximumf %34, %35 : vector<16x32xf32>
    %c1_24 = arith.constant 1 : index
    %c0_25 = arith.constant 0 : index
    %c0_26 = arith.constant 0 : index
    %37 = vector.load %arg4[%c1_24, %c0_25, %c0_26] : memref<4x32x32xf32, #tpu.memory_space<vmem>>, vector<1x32x32xf32>
    %38 = vector.shape_cast %37 : vector<1x32x32xf32> to vector<32x32xf32>
    %cst_27 = arith.constant dense<0.000000e+00> : vector<16x32xf32>
    %39 = tpu.matmul %36, %38, %cst_27 {dimension_numbers = #tpu.dot_dimension_numbers<[1], [0], [0], [1], [0, 0, 1, 1], [], []>} : vector<16x32xf32>, vector<32x32xf32>, vector<16x32xf32> -> vector<16x32xf32>
    %40 = vector.extract_strided_slice %4 {offsets = [5, 0], sizes = [1, 32], strides = [1, 1]} : vector<9x128xf32> to vector<1x32xf32>
    %41 = vector.broadcast %40 : vector<1x32xf32> to vector<16x32xf32>
    %42 = arith.addf %39, %41 : vector<16x32xf32>
    %cst_28 = arith.constant 0.000000e+00 : f32
    %43 = vector.broadcast %cst_28 : f32 to vector<16x32xf32>
    %44 = arith.maximumf %42, %43 : vector<16x32xf32>
    %cst_29 = arith.constant dense<0.000000e+00> : vector<32xf32>
    %45 = vector.multi_reduction <add>, %44, %cst_29 [0] : vector<16x32xf32> to vector<32xf32>
    %46 = vector.shape_cast %45 : vector<32xf32> to vector<1x32xf32>
    %cst_30 = arith.constant dense<0.000000e+00> : vector<16x32xf32>
    %47 = tpu.matmul %1, %44, %cst_30 {dimension_numbers = #tpu.dot_dimension_numbers<[1], [0], [0], [1], [0, 0, 1, 1], [], []>} : vector<16x16xf32>, vector<16x32xf32>, vector<16x32xf32> -> vector<16x32xf32>
    %48 = arith.addf %44, %47 : vector<16x32xf32>
    %c2 = arith.constant 2 : index
    %c0_31 = arith.constant 0 : index
    %c0_32 = arith.constant 0 : index
    %49 = vector.load %arg3[%c2, %c0_31, %c0_32] : memref<4x32x32xf32, #tpu.memory_space<vmem>>, vector<1x32x32xf32>
    %50 = vector.shape_cast %49 : vector<1x32x32xf32> to vector<32x32xf32>
    %cst_33 = arith.constant dense<0.000000e+00> : vector<16x32xf32>
    %51 = tpu.matmul %48, %50, %cst_33 {dimension_numbers = #tpu.dot_dimension_numbers<[1], [0], [0], [1], [0, 0, 1, 1], [], []>} : vector<16x32xf32>, vector<32x32xf32>, vector<16x32xf32> -> vector<16x32xf32>
    %52 = vector.extract_strided_slice %4 {offsets = [2, 0], sizes = [1, 32], strides = [1, 1]} : vector<9x128xf32> to vector<1x32xf32>
    %53 = vector.broadcast %52 : vector<1x32xf32> to vector<16x32xf32>
    %54 = arith.addf %51, %53 : vector<16x32xf32>
    %cst_34 = arith.constant 0.000000e+00 : f32
    %55 = vector.broadcast %cst_34 : f32 to vector<16x32xf32>
    %56 = arith.maximumf %54, %55 : vector<16x32xf32>
    %c2_35 = arith.constant 2 : index
    %c0_36 = arith.constant 0 : index
    %c0_37 = arith.constant 0 : index
    %57 = vector.load %arg4[%c2_35, %c0_36, %c0_37] : memref<4x32x32xf32, #tpu.memory_space<vmem>>, vector<1x32x32xf32>
    %58 = vector.shape_cast %57 : vector<1x32x32xf32> to vector<32x32xf32>
    %cst_38 = arith.constant dense<0.000000e+00> : vector<16x32xf32>
    %59 = tpu.matmul %56, %58, %cst_38 {dimension_numbers = #tpu.dot_dimension_numbers<[1], [0], [0], [1], [0, 0, 1, 1], [], []>} : vector<16x32xf32>, vector<32x32xf32>, vector<16x32xf32> -> vector<16x32xf32>
    %60 = vector.extract_strided_slice %4 {offsets = [6, 0], sizes = [1, 32], strides = [1, 1]} : vector<9x128xf32> to vector<1x32xf32>
    %61 = vector.broadcast %60 : vector<1x32xf32> to vector<16x32xf32>
    %62 = arith.addf %59, %61 : vector<16x32xf32>
    %cst_39 = arith.constant 0.000000e+00 : f32
    %63 = vector.broadcast %cst_39 : f32 to vector<16x32xf32>
    %64 = arith.maximumf %62, %63 : vector<16x32xf32>
    %cst_40 = arith.constant dense<0.000000e+00> : vector<32xf32>
    %65 = vector.multi_reduction <add>, %64, %cst_40 [0] : vector<16x32xf32> to vector<32xf32>
    %66 = vector.shape_cast %65 : vector<32xf32> to vector<1x32xf32>
    %cst_41 = arith.constant dense<0.000000e+00> : vector<16x32xf32>
    %67 = tpu.matmul %1, %64, %cst_41 {dimension_numbers = #tpu.dot_dimension_numbers<[1], [0], [0], [1], [0, 0, 1, 1], [], []>} : vector<16x16xf32>, vector<16x32xf32>, vector<16x32xf32> -> vector<16x32xf32>
    %68 = arith.addf %64, %67 : vector<16x32xf32>
    %c3 = arith.constant 3 : index
    %c0_42 = arith.constant 0 : index
    %c0_43 = arith.constant 0 : index
    %69 = vector.load %arg3[%c3, %c0_42, %c0_43] : memref<4x32x32xf32, #tpu.memory_space<vmem>>, vector<1x32x32xf32>
    %70 = vector.shape_cast %69 : vector<1x32x32xf32> to vector<32x32xf32>
    %cst_44 = arith.constant dense<0.000000e+00> : vector<16x32xf32>
    %71 = tpu.matmul %68, %70, %cst_44 {dimension_numbers = #tpu.dot_dimension_numbers<[1], [0], [0], [1], [0, 0, 1, 1], [], []>} : vector<16x32xf32>, vector<32x32xf32>, vector<16x32xf32> -> vector<16x32xf32>
    %72 = vector.extract_strided_slice %4 {offsets = [3, 0], sizes = [1, 32], strides = [1, 1]} : vector<9x128xf32> to vector<1x32xf32>
    %73 = vector.broadcast %72 : vector<1x32xf32> to vector<16x32xf32>
    %74 = arith.addf %71, %73 : vector<16x32xf32>
    %cst_45 = arith.constant 0.000000e+00 : f32
    %75 = vector.broadcast %cst_45 : f32 to vector<16x32xf32>
    %76 = arith.maximumf %74, %75 : vector<16x32xf32>
    %c3_46 = arith.constant 3 : index
    %c0_47 = arith.constant 0 : index
    %c0_48 = arith.constant 0 : index
    %77 = vector.load %arg4[%c3_46, %c0_47, %c0_48] : memref<4x32x32xf32, #tpu.memory_space<vmem>>, vector<1x32x32xf32>
    %78 = vector.shape_cast %77 : vector<1x32x32xf32> to vector<32x32xf32>
    %cst_49 = arith.constant dense<0.000000e+00> : vector<16x32xf32>
    %79 = tpu.matmul %76, %78, %cst_49 {dimension_numbers = #tpu.dot_dimension_numbers<[1], [0], [0], [1], [0, 0, 1, 1], [], []>} : vector<16x32xf32>, vector<32x32xf32>, vector<16x32xf32> -> vector<16x32xf32>
    %80 = vector.extract_strided_slice %4 {offsets = [7, 0], sizes = [1, 32], strides = [1, 1]} : vector<9x128xf32> to vector<1x32xf32>
    %81 = vector.broadcast %80 : vector<1x32xf32> to vector<16x32xf32>
    %82 = arith.addf %79, %81 : vector<16x32xf32>
    %cst_50 = arith.constant 0.000000e+00 : f32
    %83 = vector.broadcast %cst_50 : f32 to vector<16x32xf32>
    %84 = arith.maximumf %82, %83 : vector<16x32xf32>
    %cst_51 = arith.constant dense<0.000000e+00> : vector<32xf32>
    %85 = vector.multi_reduction <add>, %84, %cst_51 [0] : vector<16x32xf32> to vector<32xf32>
    %86 = vector.shape_cast %85 : vector<32xf32> to vector<1x32xf32>
    %87 = tpu.concatenate %6, %26, %46, %66, %86 in 1 : vector<1x32xf32>, vector<1x32xf32>, vector<1x32xf32>, vector<1x32xf32>, vector<1x32xf32> -> vector<1x160xf32>
    %c0_52 = arith.constant 0 : index
    %c0_53 = arith.constant 0 : index
    %88 = vector.load %arg6[%c0_52, %c0_53] : memref<160x128xf32, #tpu.memory_space<vmem>>, vector<160x128xf32>
    %cst_54 = arith.constant dense<0.000000e+00> : vector<1x128xf32>
    %89 = tpu.matmul %87, %88, %cst_54 {dimension_numbers = #tpu.dot_dimension_numbers<[1], [0], [0], [1], [0, 0, 1, 1], [], []>} : vector<1x160xf32>, vector<160x128xf32>, vector<1x128xf32> -> vector<1x128xf32>
    %90 = vector.extract_strided_slice %4 {offsets = [8, 0], sizes = [1, 128], strides = [1, 1]} : vector<9x128xf32> to vector<1x128xf32>
    %91 = arith.addf %89, %90 : vector<1x128xf32>
    %c0_55 = arith.constant 0 : index
    %c0_56 = arith.constant 0 : index
    %c0_57 = arith.constant 0 : index
    %92 = vector.load %arg7[%c0_55, %c0_56, %c0_57] : memref<1x1x128xf32, #tpu.memory_space<vmem>>, vector<1x1x128xf32>
    %93 = vector.shape_cast %92 : vector<1x1x128xf32> to vector<1x128xf32>
    %94 = vector.shape_cast %91 : vector<1x128xf32> to vector<1x1x128xf32>
    tpu.vector_store %arg7[%c0_55, %c0_56, %c0_57], %94 {strides = array<i32>} : memref<1x1x128xf32, #tpu.memory_space<vmem>>, vector<1x1x128xf32>,
    return
  }
  func.func @transform_0(%arg0: i32) -> (i32, i32, i32) {
    %c0_i32 = arith.constant 0 : i32
    %c0_i32_0 = arith.constant 0 : i32
    %c0_i32_1 = arith.constant 0 : i32
    return %arg0, %c0_i32, %c0_i32_0 : i32, i32, i32
  }
  func.func @transform_1(%arg0: i32) -> (i32, i32, i32) {
    %c0_i32 = arith.constant 0 : i32
    %c0_i32_0 = arith.constant 0 : i32
    %c0_i32_1 = arith.constant 0 : i32
    return %arg0, %c0_i32, %c0_i32_0 : i32, i32, i32
  }
  func.func @transform_2(%arg0: i32) -> (i32, i32, i32) {
    %c0_i32 = arith.constant 0 : i32
    %c0_i32_0 = arith.constant 0 : i32
    %c0_i32_1 = arith.constant 0 : i32
    %c0_i32_2 = arith.constant 0 : i32
    return %c0_i32, %c0_i32_0, %c0_i32_1 : i32, i32, i32
  }
  func.func @transform_3(%arg0: i32) -> (i32, i32, i32) {
    %c0_i32 = arith.constant 0 : i32
    %c0_i32_0 = arith.constant 0 : i32
    %c0_i32_1 = arith.constant 0 : i32
    %c0_i32_2 = arith.constant 0 : i32
    return %c0_i32, %c0_i32_0, %c0_i32_1 : i32, i32, i32
  }
  func.func @transform_4(%arg0: i32) -> (i32, i32) {
    %c0_i32 = arith.constant 0 : i32
    %c0_i32_0 = arith.constant 0 : i32
    %c0_i32_1 = arith.constant 0 : i32
    return %c0_i32, %c0_i32_0 : i32, i32
  }
  func.func @transform_5(%arg0: i32) -> (i32, i32) {
    %c0_i32 = arith.constant 0 : i32
    %c0_i32_0 = arith.constant 0 : i32
    %c0_i32_1 = arith.constant 0 : i32
    return %c0_i32, %c0_i32_0 : i32, i32
  }
  func.func @transform_6(%arg0: i32) -> (i32, i32, i32) {
    %c0_i32 = arith.constant 0 : i32
    %c0_i32_0 = arith.constant 0 : i32
    %c0_i32_1 = arith.constant 0 : i32
    return %arg0, %c0_i32, %c0_i32_0 : i32, i32, i32
  }
}

</mosaic_0001>

<bundles_post_ra>
// kernel: gin_forward.1
= control target key start
LH: loop header
LB: loop body
LE: loop exit
PB: predicated region body
PF: predicated region fallthrough
CT: control target
= control target key end

     0   :  { %11 = vsyncpa [#allocation3], 0  ;;  %s1496_s0 = inlined_call_operand.vmem [shape: f32[2,16,16], index: 0, kind: input, shape index: {}]   ;;  %s1497_s1 = inlined_call_operand.vmem [shape: f32[2,16,32], index: 1, kind: input, shape index: {}]   ;;  %s1498_s2 = inlined_call_operand.hbm [shape: f32[4,32,32], index: 2, kind: input, shape index: {}]   ;;  %s1499_s3 = inlined_call_operand.hbm [shape: f32[4,32,32], index: 3, kind: input, shape index: {}]   ;;  %s1500_s4 = inlined_call_operand.vmem [shape: f32[9,128], index: 4, kind: input, shape index: {}]   ;;  %s1501_s5 = inlined_call_operand.hbm [shape: f32[160,128], index: 5, kind: input, shape index: {}]   ;;  %s1502_s6 = inlined_call_operand.hbm [shape: f32[2,1,128], index: 6, kind: output, shape index: {}]  }
   0x1   :  { %12 = vsyncpa [#allocation6], 0 }
   0x2   :  { %13 = vsyncpa [#allocation4], 0 }
   0x3   :  { %15 = vsyncpa [#allocation4 + $0x1], 0  ;;  %s1289_s21 = smov 0   ;;  %s1291_s22 = smov 0  }
   0x4   :  { %s1293_s23 = smov 0   ;;  %s1295_s24 = smov 0  }
   0x5 LB: > { %s1310_s25 = sadd.s32 4294967295, %s1244_s24   ;;  %s964_s26 = sadd.s32 4294967294, %s1244_s24   ;;  %s1244_s24 = sphi %s1295_s24, %s1510_s24   ;;  %s1240_s23 = sphi %s1293_s23, %s1509_s23   ;;  %s1236_s22 = sphi %s1291_s22, %s1508_s22   ;;  %s1232_s21 = sphi %s1289_s21, %s1507_s21  }
   0x6   : > { %s1314_s27 = sadd.s32 1, %s1244_s24   ;;  %s164_s28 = sadd.s32 1, %s1240_s23 }
   0x7   : > { %s161_s29 = ssub.s32 %s1244_s24, %s1314_s27  ;;  %p174_p0 = scmp.ne.s32.totalorder %s1240_s23, %s1236_s22 }
   0x8   : > { %p162_p1 = scmp.eq.s32.totalorder %s161_s29, 0  ;;  %p175_p2 = scmp.eq.s32.totalorder %s1310_s25, 1 }
   0x9   : > { %p180_p3 = scmp.ne.s32.totalorder %s1236_s22, %s1232_s21  ;;  %p181_p4 = scmp.eq.s32.totalorder %s964_s26, 1 }
   0xa   : > { %s1325_s30 = scalar_select %p162_p1, %s1240_s23, %s164_s28  }
   0xb   : > { %p1327_p5 = por %p175_p2, %p174_p0  ;;  %p1331_p6 = por %p181_p4, %p180_p3 }
   0xc   : > { %p965_p7 = scmp.ge.s32.totalorder %s1244_s24, 1  ;;  %p188_p8 = scmp.lt.s32.totalorder %s1244_s24, 3 }
   0xd   : > { %p1037_p9 = scmp.eq.s32.totalorder %s1310_s25, 0  ;;  %s213_s12 = sshll.u32 %s1499_s3, 4  ;;  %s214_s12 = int_to_ptr.hbm [resolvable:$true] %s213_s12 }
   0xe   : > { %p1338_p10 = pnand %p965_p7, %p188_p8  ;;  %s199_s15 = sshll.u32 %s1498_s2, 4  ;;  %s200_s15 = int_to_ptr.hbm [resolvable:$true] %s199_s15 }
   0xf   : > { %s1246_s17 = smov [#allocation5]   ;;  %s1247_s19 = smov 128  }
  0x10   : > { %p1023_p11 = pneg %p1338_p10  ;;  %s215_s18 = sshll.u32 %s1246_s17, 4  ;;  %s216_s18 = int_to_ptr.vmem [resolvable:$true] %s215_s18 }
  0x11   : > { %s1248_s20 = smov 8   ;;  %s1249_s26 = smov [#allocation2]  }
  0x12   : > { %p1352_p12 = pnand %p1037_p9, %p1023_p11  ;;  %s201_s28 = sshll.u32 %s1249_s26, 4  ;;  %s202_s28 = int_to_ptr.vmem [resolvable:$true] %s201_s28 }
  0x13   : > { %s230_s11 = sshll.u32 %s1501_s5, 4  ;;  %s1250_s13 = smov [#allocation7]   ;;  %s231_s11 = int_to_ptr.hbm [resolvable:$true] %s230_s11 }
  0x14   : > { %1029 = dma.hbm_to_vmem [thread:$0]  (!%p1352_p12), %s214_s12, 2048, %s216_s18, [#allocation6], %s1247_s19, %s1247_s19, %s1248_s20  }
  0x15   : > { %1026 = dma.hbm_to_vmem [thread:$0]  (!%p1352_p12), %s200_s15, 2048, %s202_s28, [#allocation3], %s1247_s19, %s1247_s19, %s1248_s20  }
  0x16   : > { %s232_s14 = sshll.u32 %s1250_s13, 4  ;;  %264 = sbr.rel (%p1338_p10) target bundleno = 1821 (0x71d), region = 44  ;;  %s233_s14 = int_to_ptr.vmem [resolvable:$true] %s232_s14 }
  0x17   : > { %1032 = dma.hbm_to_vmem [thread:$0]  (!%p1352_p12), %s231_s11, 2560, %s233_s14, [#allocation6], %s1247_s19, %s1247_s19, %s1248_s20  }
  0x1b   : > { %1219 = dma.done.wait (%p1037_p9), [#allocation3], 2048  }
  0x1c   : > { %1221 = vsyncadd (%p1037_p9), [#allocation3], 4294965248 }
  0x1d   : > { %1223 = dma.done.wait (%p1037_p9), [#allocation6], 4608  }
  0x1e   : > { %1225 = vsyncadd (%p1037_p9), [#allocation6], 4294962688  ;;  %p309_p13 = scmp.lt.s32.totalorder %s1310_s25, 1  ;;  %vm335_vm0 = vcmask 130048   ;;  %v370_v4 = vld [vmem:[#allocation2 + $0x18] sm:$0xff]  ;;  %v369_v5 = vld [vmem:[#allocation2 + $0x10] sm:$0xff] }
  0x1f   : > { %v368_v6 = vld [vmem:[#allocation2 + $0x8] sm:$0xff]  ;;  %v367_v7 = vld [vmem:[#allocation2] sm:$0xff]  ;;  %v406_v8 = vld [vmem:[#allocation5 + $0x18] sm:$0xff]  ;;  %vm325_vm1 = vcmask 261120   ;;  %s1251_s29 = smov 32   ;;  %s1252_s10 = smov 64  }
  0x20   : > { %s310_s12 = scalar_select %p309_p13, %s1310_s25, 1  ;;  %v405_v13 = vld [vmem:[#allocation5 + $0x10] sm:$0xff]  ;;  %v404_v14 = vld [vmem:[#allocation5 + $0x8] sm:$0xff]  ;;  %v403_v15 = vld [vmem:[#allocation5] sm:$0xff]  ;;  %vm785_vm2 = vcmask 523264   ;;  %vm787_vm3 = vcmask 785408  }
  0x21   : > { %v1406_v16 = vld [vmem:[%s1500_s4] sm:$0xff]  ;;  %v477_v40 = vld [vmem:[#allocation2 + $0x38] sm:$0xff]  ;;  %v476_v41 = vld [vmem:[#allocation2 + $0x30] sm:$0xff]  ;;  %s1253_s11 = smov 96   ;;  %s307_s13 = sand.u32 1, %s1236_s22  }
  0x22   : > { %s1005_s15 = sshll.u32 %s310_s12, 4  ;;  %v371_v17 = vperm.slane %v1406_v16, 0  ;;  %v407_v25 = vperm.slane %v1406_v16, 4  ;;  %497 = vmatpush.msra.mxu0 %v477_v40  ;;  %v475_v42 = vld [vmem:[#allocation2 + $0x28] sm:$0xff]  ;;  %v474_v43 = vld [vmem:[#allocation2 + $0x20] sm:$0xff]  ;;  %v514_v44 = vld [vmem:[#allocation5 + $0x38] sm:$0xff] }
  0x23   : > { %s318_s17 = scalar_lea.vmem %s1497_s1, %s1005_s15  ;;  %s313_s20 = scalar_lea.vmem %s1496_s0, %s1005_s15  ;;  %v513_v49 = vld [vmem:[#allocation5 + $0x30] sm:$0xff]  ;;  %v512_v50 = vld [vmem:[#allocation5 + $0x28] sm:$0xff]  ;;  %v511_v51 = vld [vmem:[#allocation5 + $0x20] sm:$0xff]  ;;  %v478_v52 = vperm.slane %v1406_v16, 1  ;;  %v515_v62 = vperm.slane %v1406_v16, 5  ;;  %v623_v40 = vperm.slane %v1406_v16, 6 }
  0x24   : > { %v1383_v0 = vld [vmem:[%s318_s17 + $0x8] sm:$0xff]  ;;  %v1385_v1 = vld [vmem:[%s318_s17] sm:$0xff]  ;;  %498 = vmatpush.msra.mxu0 %v476_v41  ;;  %v585_v59 = vld [vmem:[#allocation2 + $0x58] sm:$0xff]  ;;  %s862_s15 = scalar_lea.hbm %s1502_s6, %s1310_s25  ;;  %s308_s17 = scalar_lea.vmem [#allocation8], %s307_s13 }
  0x25   : > { %356 = vmatpush.msra.mxu1 %v1383_v0  ;;  %1007 = vmatpush.msra.mxu2 %v1383_v0  ;;  %v1389_v2 = vld [vmem:[%s313_s20] sm:$0xff]  ;;  %v1391_v3 = vld [vmem:[%s313_s20 + $0x8] sm:$0xff]  ;;  %v584_v60 = vld [vmem:[#allocation2 + $0x50] sm:$0xff]  ;;  %s864_s18 = sshll.u32 %s308_s17, 4  ;;  %s866_s19 = sshll.u32 %s862_s15, 4  ;;  %s865_s18 = int_to_ptr.vmem [resolvable:$true] %s864_s18  ;;  %s867_s19 = int_to_ptr.hbm [resolvable:$true] %s866_s19 }
  0x26   : > { %499 = vmatpush.msra.mxu0 %v475_v42  ;;  %v800_v41 = vld [vmem:[#allocation7 + $0x58] sm:$0xff]  ;;  %v799_v42 = vld [vmem:[#allocation7 + $0x50] sm:$0xff]  ;;  %s854_s20 = scalar_lea.sflag [#allocation4], %s307_s13  ;;  %s1188_s26 = sshra.s32 %s867_s19, 4  ;;  %s1189_s26 = int_to_ptr.hbm [resolvable:$true] %s1188_s26 }
  0x27   : > { %357 = vmatpush.msra.mxu1 %v1385_v1  ;;  %1008 = vmatpush.msra.mxu2 %v1385_v1  ;;  %s1190_s28 = scalar_lea.hbm %s1189_s26, 1  ;;  %p1195_p3 = scmp.lt.s32.totalorder %s1189_s26, %s1502_s6 }
  0x28   : > { %978 = vmatmul.msk.f32.vlgmr.msra.gmra.mxu1 %vm335_vm0, %v1389_v2  ;;  %979 = vmatmul.msk.f32.vlgmr.msra.gmra.mxu2 %vm335_vm0, %v1391_v3  ;;  %p1191_p0 = scmp.ne.s32.totalorder %s1189_s26, %s1190_s28 }
  0x29   : > { %390 = vmatpush.msrb.mxu1 %v370_v4  ;;  %426 = vmatpush.msrb.mxu2 %v406_v8 }
  0x2a   : > { %500 = vmatpush.msra.mxu0 %v474_v43  ;;  %p1192_p1 = pnand %p1191_p0, %p1327_p5 }
  0x2b   : > { %391 = vmatpush.msrb.mxu1 %v369_v5  ;;  %427 = vmatpush.msrb.mxu2 %v405_v13 }
  0x2c   : > { %p1193_p2 = pneg %p1192_p1 }
  0x2d   : > { %392 = vmatpush.msrb.mxu1 %v368_v6  ;;  %428 = vmatpush.msrb.mxu2 %v404_v14 }
  0x2f   : > { %393 = vmatpush.msrb.mxu1 %v367_v7  ;;  %429 = vmatpush.msrb.mxu2 %v403_v15 }
  0x31   : > { %605 = vmatpush.msra.mxu2 %v585_v59  ;;  %v792_v59 = vld [vmem:[#allocation7 + $0x18] sm:$0xff] }
  0x33   : > { %606 = vmatpush.msra.mxu2 %v584_v60 }
  0xa5   : > { %v359_v9 = vpop.f32.mrf.mxu1 }
  0xa6   : > { %v365_v10 = vadd.f32 %v359_v9, %v1385_v1 }
  0xa8   : > { %980 = vmatmul.msk.f32.vlgmr.msrb.gmra.mxu1 %vm325_vm1, %v365_v10 }
  0xab   : > { %v362_v11 = vpop.f32.mrf.mxu2 }
  0xac   : > { %v366_v12 = vadd.f32 %v362_v11, %v1383_v0 }
  0xb0   : > { %981 = vmatmul.msk.f32.gmra.mxu1 %vm325_vm1, %v366_v12 }
 0x125   : > { %v395_v18 = vpop.f32.mrf.mxu1 }
 0x126   : > { %v396_v19 = vadd.f32 %v395_v18, %v371_v17  ;;  %v583_v18 = vld [vmem:[#allocation2 + $0x48] sm:$0xff] }
 0x127   : > { %607 = vmatpush.msra.mxu2 %v583_v18 }
 0x128   : > { %v401_v20 = vmax.f32 %v396_v19, 0.0  ;;  %v582_v19 = vld [vmem:[#allocation2 + $0x40] sm:$0xff] }
 0x129   : > { %608 = vmatpush.msra.mxu2 %v582_v19 }
 0x12a   : > { %982 = vmatmul.msk.f32.vlgmr.msrb.gmra.mxu2 %vm325_vm1, %v401_v20  ;;  %v622_v20 = vld [vmem:[#allocation5 + $0x58] sm:$0xff] }
 0x12b   : > { %642 = vmatpush.msrb.mxu0 %v622_v20 }
 0x12d   : > { %v398_v21 = vpop.f32.mrf.mxu1 }
 0x12e   : > { %v399_v22 = vadd.f32 %v398_v21, %v371_v17 }
 0x130   : > { %v402_v23 = vmax.f32 %v399_v22, 0.0 }
 0x132   : > { %983 = vmatmul.msk.f32.gmra.mxu2 %vm325_vm1, %v402_v23 }
 0x1ad   : > { %v431_v24 = vpop.f32.mrf.mxu2 }
 0x1ae   : > { %v432_v26 = vadd.f32 %v431_v24, %v407_v25 }
 0x1b0   : > { %v437_v28 = vmax.f32 %v432_v26, 0.0  ;;  %v620_v26 = vld [vmem:[#allocation5 + $0x48] sm:$0xff] }
 0x1b2   : > { %v439_v31 = vsel %vm325_vm1, %v437_v28, 0.0 }
 0x1b5   : > { %v434_v27 = vpop.f32.mrf.mxu2 }
 0x1b6   : > { %v435_v29 = vadd.f32 %v434_v27, %v407_v25  ;;  %v621_v25 = vld [vmem:[#allocation5 + $0x50] sm:$0xff]  ;;  %v619_v27 = vld [vmem:[#allocation5 + $0x40] sm:$0xff] }
 0x1b7   : > { %643 = vmatpush.msrb.mxu0 %v621_v25 }
 0x1b8   : > { %v438_v30 = vmax.f32 %v435_v29, 0.0 }
 0x1b9   : > { %644 = vmatpush.msrb.mxu0 %v620_v26 }
 0x1ba   : > { %v440_v32 = vsel %vm325_vm1, %v438_v30, 0.0  ;;  %462 = vmatpush.msra.mxu3 %v438_v30 }
 0x1bb   : > { %v441_v33 = vadd.f32 %v440_v32, %v439_v31  ;;  %645 = vmatpush.msrb.mxu0 %v619_v27  ;;  %v730_v27 = vld [vmem:[#allocation5 + $0x78] sm:$0xff] }
 0x1bc   : > { %463 = vmatpush.msra.mxu3 %v437_v28  ;;  %750 = vmatpush.msrb.mxu2 %v730_v27 }
 0x1bd   : > { %984 = vmatmul.msk.f32.vlgmr.msra.gmra.mxu3 %vm335_vm0, %v1389_v2  ;;  %v442_v34 = vrot.slane %v441_v33, 4 }
 0x1be   : > { %534 = vmatpush.msrb.mxu3 %v514_v44  ;;  %v798_v44 = vld [vmem:[#allocation7 + $0x48] sm:$0xff] }
 0x1bf   : > { %v443_v35 = vadd.f32 %v442_v34, %v441_v33 }
 0x1c0   : > { %535 = vmatpush.msrb.mxu3 %v513_v49  ;;  %v796_v49 = vld [vmem:[#allocation7 + $0x38] sm:$0xff] }
 0x1c1   : > { %v444_v36 = vrot.slane %v443_v35, 2 }
 0x1c2   : > { %536 = vmatpush.msrb.mxu3 %v512_v50 }
 0x1c3   : > { %v445_v37 = vadd.f32 %v444_v36, %v443_v35  ;;  %v804_v35 = vld [vmem:[#allocation7 + $0x78] sm:$0xff]  ;;  %v803_v36 = vld [vmem:[#allocation7 + $0x70] sm:$0xff] }
 0x1c4   : > { %537 = vmatpush.msrb.mxu3 %v511_v51  ;;  %v795_v51 = vld [vmem:[#allocation7 + $0x30] sm:$0xff] }
 0x1c5   : > { %985 = vmatmul.msk.f32.gmra.mxu3 %vm335_vm0, %v1391_v3  ;;  %v446_v38 = vrot.slane %v445_v37, 1 }
 0x1c7   : > { %v447_v39 = vadd.f32 %v446_v38, %v445_v37  ;;  %v802_v37 = vld [vmem:[#allocation7 + $0x68] sm:$0xff] }
 0x1c9   : > { %773 = vrot.lane.b32.xlu0 %v447_v39, %s1251_s29  ;;  %v801_v39 = vld [vmem:[#allocation7 + $0x60] sm:$0xff] }
 0x240   : > { %v465_v45 = vpop.f32.mrf.mxu3 }
 0x241   : > { %v471_v46 = vadd.f32 %v465_v45, %v437_v28  ;;  %v586_v28 = vperm.slane %v1406_v16, 2 }
 0x243   : > { %986 = vmatmul.msk.f32.vlgmr.msra.gmra.mxu0 %vm325_vm1, %v471_v46  ;;  %v797_v46 = vld [vmem:[#allocation7 + $0x40] sm:$0xff] }
 0x244   : > { %812 = vmatpush.msra.mxu0 %v804_v35 }
 0x246   : > { %813 = vmatpush.msra.mxu0 %v803_v36 }
 0x248   : > { %v468_v47 = vpop.f32.mrf.mxu3  ;;  %814 = vmatpush.msra.mxu0 %v802_v37 }
 0x249   : > { %v472_v48 = vadd.f32 %v468_v47, %v438_v30 }
 0x24a   : > { %815 = vmatpush.msra.mxu0 %v801_v39  ;;  %v807_v39 = vld [vmem:[#allocation7 + $0x90] sm:$0xff] }
 0x24b   : > { %987 = vmatmul.msk.f32.gmra.mxu0 %vm325_vm1, %v472_v48 }
 0x24c   : > { %816 = vmatpush.msra.mxu0 %v800_v41  ;;  %v805_v41 = vld [vmem:[#allocation7 + $0x80] sm:$0xff] }
 0x24e   : > { %817 = vmatpush.msra.mxu0 %v799_v42 }
 0x250   : > { %818 = vmatpush.msra.mxu0 %v798_v44 }
 0x252   : > { %819 = vmatpush.msra.mxu0 %v797_v46 }
 0x254   : > { %820 = vmatpush.msra.mxu0 %v796_v49 }
 0x256   : > { %821 = vmatpush.msra.mxu0 %v795_v51 }
 0x2c0   : > { %v502_v53 = vpop.f32.mrf.mxu0 }
 0x2c1   : > { %v503_v54 = vadd.f32 %v502_v53, %v478_v52 }
 0x2c3   : > { %v508_v55 = vmax.f32 %v503_v54, 0.0 }
 0x2c5   : > { %988 = vmatmul.msk.f32.vlgmr.msrb.gmra.mxu3 %vm325_vm1, %v508_v55  ;;  %v794_v55 = vld [vmem:[#allocation7 + $0x28] sm:$0xff] }
 0x2c6   : > { %822 = vmatpush.msra.mxu0 %v794_v55 }
 0x2c8   : > { %v505_v56 = vpop.f32.mrf.mxu0 }
 0x2c9   : > { %v506_v57 = vadd.f32 %v505_v56, %v478_v52 }
 0x2cb   : > { %v509_v58 = vmax.f32 %v506_v57, 0.0  ;;  %v793_v57 = vld [vmem:[#allocation7 + $0x20] sm:$0xff] }
 0x2cc   : > { %823 = vmatpush.msra.mxu0 %v793_v57 }
 0x2cd   : > { %989 = vmatmul.msk.f32.gmra.mxu3 %vm325_vm1, %v509_v58 }
 0x2ce   : > { %824 = vmatpush.msra.mxu0 %v792_v59 }
 0x348   : > { %v539_v61 = vpop.f32.mrf.mxu3 }
 0x349   : > { %v540_v63 = vadd.f32 %v539_v61, %v515_v62  ;;  %v791_v61 = vld [vmem:[#allocation7 + $0x10] sm:$0xff] }
 0x34a   : > { %825 = vmatpush.msra.mxu0 %v791_v61 }
 0x34b   : > { %v545_v5 = vmax.f32 %v540_v63, 0.0  ;;  %v790_v63 = vld [vmem:[#allocation7 + $0x8] sm:$0xff] }
 0x34c   : > { %826 = vmatpush.msra.mxu0 %v790_v63 }
 0x34d   : > { %v547_v8 = vsel %vm325_vm1, %v545_v5, 0.0 }
 0x350   : > { %v542_v4 = vpop.f32.mrf.mxu3 }
 0x351   : > { %v543_v6 = vadd.f32 %v542_v4, %v515_v62 }
 0x353   : > { %v546_v7 = vmax.f32 %v543_v6, 0.0  ;;  %v326_v6 = vsel %vm325_vm1, %v1385_v1, 0.0 }
 0x355   : > { %v548_v9 = vsel %vm325_vm1, %v546_v7, 0.0  ;;  %570 = vmatpush.msra.mxu1 %v546_v7 }
 0x356   : > { %v549_v10 = vadd.f32 %v548_v9, %v547_v8  ;;  %v789_v8 = vld [vmem:[#allocation7] sm:$0xff]  ;;  %v692_v9 = vld [vmem:[#allocation2 + $0x70] sm:$0xff] }
 0x357   : > { %571 = vmatpush.msra.mxu1 %v545_v5  ;;  %827 = vmatpush.msra.mxu0 %v789_v8 }
 0x358   : > { %v550_v11 = vrot.slane %v549_v10, 4  ;;  %990 = vmatmul.msk.f32.vlgmr.msra.gmra.mxu1 %vm335_vm0, %v1389_v2 }
 0x35a   : > { %v551_v12 = vadd.f32 %v550_v11, %v549_v10  ;;  %v691_v11 = vld [vmem:[#allocation2 + $0x68] sm:$0xff] }
 0x35c   : > { %v552_v13 = vrot.slane %v551_v12, 2 }
 0x35e   : > { %v553_v14 = vadd.f32 %v552_v13, %v551_v12 }
 0x360   : > { %991 = vmatmul.msk.f32.gmra.mxu1 %vm335_vm0, %v1391_v3  ;;  %v554_v15 = vrot.slane %v553_v14, 1 }
 0x362   : > { %v555_v17 = vadd.f32 %v554_v15, %v553_v14 }
 0x364   : > { %777 = vrot.lane.b32.xlu0 %v555_v17, %s1252_s10  ;;  %v774_v17 = vpop.permute.xlu0 %773  ;;  %s1194_s10 = scalar_lea.hbm %s1502_s6, 2 }
 0x365   : > { %p1196_p4 = scmp.lt.s32.totalorder %s1194_s10, %s1190_s28 }
 0x367   : > { %p1197_p7 = por %p1196_p4, %p1195_p3 }
 0x369   : > { %p1198_p8 = pnand %p1197_p7, %p1193_p2 }
 0x3d5   : > { %v573_v21 = vpop.f32.mrf.mxu1 }
 0x3d6   : > { %v579_v22 = vadd.f32 %v573_v21, %v545_v5  ;;  %v778_v1 = vpop.permute.xlu0 %777 }
 0x3d8   : > { %992 = vmatmul.msk.f32.vlgmr.msra.gmra.mxu2 %vm325_vm1, %v579_v22 }
 0x3dd   : > { %v576_v23 = vpop.f32.mrf.mxu1 }
 0x3de   : > { %v580_v24 = vadd.f32 %v576_v23, %v546_v7  ;;  %v693_v7 = vld [vmem:[#allocation2 + $0x78] sm:$0xff] }
 0x3df   : > { %713 = vmatpush.msrb.mxu1 %v693_v7 }
 0x3e0   : > { %993 = vmatmul.msk.f32.gmra.mxu2 %vm325_vm1, %v580_v24 }
 0x3e1   : > { %714 = vmatpush.msrb.mxu1 %v692_v9 }
 0x3e3   : > { %715 = vmatpush.msrb.mxu1 %v691_v11 }
 0x45b   : > { %v610_v29 = vpop.f32.mrf.mxu2 }
 0x45c   : > { %v611_v30 = vadd.f32 %v610_v29, %v586_v28  ;;  %v728_v29 = vld [vmem:[#allocation5 + $0x68] sm:$0xff] }
 0x45e   : > { %v616_v31 = vmax.f32 %v611_v30, 0.0  ;;  %v727_v30 = vld [vmem:[#allocation5 + $0x60] sm:$0xff] }
 0x460   : > { %994 = vmatmul.msk.f32.vlgmr.msrb.gmra.mxu0 %vm325_vm1, %v616_v31  ;;  %v694_v31 = vperm.slane %v1406_v16, 3 }
 0x463   : > { %v613_v32 = vpop.f32.mrf.mxu2 }
 0x464   : > { %v614_v33 = vadd.f32 %v613_v32, %v586_v28  ;;  %v729_v28 = vld [vmem:[#allocation5 + $0x70] sm:$0xff] }
 0x465   : > { %751 = vmatpush.msrb.mxu2 %v729_v28 }
 0x466   : > { %v617_v34 = vmax.f32 %v614_v33, 0.0 }
 0x467   : > { %752 = vmatpush.msrb.mxu2 %v728_v29 }
 0x468   : > { %995 = vmatmul.msk.f32.gmra.mxu0 %vm325_vm1, %v617_v34 }
 0x469   : > { %753 = vmatpush.msrb.mxu2 %v727_v30 }
 0x4dd   : > { %v647_v38 = vpop.f32.mrf.mxu0 }
 0x4de   : > { %v648_v43 = vadd.f32 %v647_v38, %v623_v40  ;;  %v808_v38 = vld [vmem:[#allocation7 + $0x98] sm:$0xff] }
 0x4e0   : > { %v1436_v47 = vmax.f32 %v648_v43, 0.0  ;;  %v731_v43 = vperm.slane %v1406_v16, 7  ;;  %v324_v16 = vld [vmem:[%s1500_s4 + $0x8] sm:$0x1] }
 0x4e2   : > { %v655_v52 = vsel %vm325_vm1, %v1436_v47, 0.0 }
 0x4e5   : > { %v650_v45 = vpop.f32.mrf.mxu0 }
 0x4e6   : > { %v651_v48 = vadd.f32 %v650_v45, %v623_v40  ;;  %v806_v40 = vld [vmem:[#allocation7 + $0x88] sm:$0xff] }
 0x4e8   : > { %v654_v50 = vmax.f32 %v651_v48, 0.0 }
 0x4ea   : > { %v656_v53 = vsel %vm325_vm1, %v654_v50, 0.0  ;;  %678 = vmatpush.msra.mxu3 %v654_v50 }
 0x4eb   : > { %v657_v54 = vadd.f32 %v656_v53, %v655_v52 }
 0x4ec   : > { %679 = vmatpush.msra.mxu3 %v1436_v47 }
 0x4ed   : > { %996 = vmatmul.msk.f32.vlgmr.msra.gmra.mxu3 %vm335_vm0, %v1389_v2  ;;  %v658_v56 = vrot.slane %v657_v54, 4  ;;  %v327_v2 = vsel %vm325_vm1, %v1383_v0, 0.0 }
 0x4ee   : > { %v328_v10 = vadd.f32 %v327_v2, %v326_v6  ;;  %844 = vmatpush.msrb.mxu3 %v808_v38 }
 0x4ef   : > { %v659_v58 = vadd.f32 %v658_v56, %v657_v54 }
 0x4f0   : > { %v329_v12 = vrot.slane %v328_v10, 4  ;;  %845 = vmatpush.msrb.mxu3 %v807_v39 }
 0x4f1   : > { %v660_v60 = vrot.slane %v659_v58, 2 }
 0x4f2   : > { %v330_v13 = vadd.f32 %v329_v12, %v328_v10  ;;  %846 = vmatpush.msrb.mxu3 %v806_v40 }
 0x4f3   : > { %v661_v62 = vadd.f32 %v660_v60, %v659_v58 }
 0x4f4   : > { %v331_v14 = vrot.slane %v330_v13, 2  ;;  %847 = vmatpush.msrb.mxu3 %v805_v41 }
 0x4f5   : > { %997 = vmatmul.msk.f32.gmra.mxu3 %vm335_vm0, %v1391_v3  ;;  %v662_v4 = vrot.slane %v661_v62, 1  ;;  %v690_v3 = vld [vmem:[#allocation2 + $0x60] sm:$0xff] }
 0x4f6   : > { %716 = vmatpush.msrb.mxu1 %v690_v3  ;;  %v332_v15 = vadd.f32 %v331_v14, %v330_v13 }
 0x4f7   : > { %v663_v5 = vadd.f32 %v662_v4, %v661_v62 }
 0x4f8   : > { %v333_v0 = vrot.slane %v332_v15, 1 }
 0x4f9   : > { %781 = vrot.lane.b32.xlu1 %v663_v5, %s1253_s11 }
 0x4fa   : > { %v334_v18 = vadd.f32 %v333_v0, %v332_v15 }
 0x4fc   : > { %v784_v19 = vsel %vm325_vm1, %v334_v18, %v774_v17 }
 0x4fd   : > { %v786_v20 = vsel %vm785_vm2, %v784_v19, %v778_v1 }
 0x56b   : > { %v782_v21 = vpop.permute.xlu1 %781 }
 0x56c   : > { %v788_v22 = vsel %vm787_vm3, %v786_v20, %v782_v21 }
 0x56d   : > { %828 = vmatmul.f32.vlgmr.msra.gmra.mxu0 %v788_v22 }
 0x570   : > { %v681_v23 = vpop.f32.mrf.mxu3 }
 0x571   : > { %v687_v24 = vadd.f32 %v681_v23, %v1436_v47 }
 0x573   : > { %998 = vmatmul.msk.f32.vlgmr.msrb.gmra.mxu1 %vm325_vm1, %v687_v24 }
 0x578   : > { %v684_v25 = vpop.f32.mrf.mxu3 }
 0x579   : > { %v688_v26 = vadd.f32 %v684_v25, %v654_v50 }
 0x57b   : > { %999 = vmatmul.msk.f32.gmra.mxu1 %vm325_vm1, %v688_v26 }
 0x5ea   : > { %v829_v58 = vpop.f32.mrf.mxu0 }
 0x5eb   : > { %v830_v59 = vadd.f32 %v829_v58, %v324_v16 }
 0x5f0   : > { %v718_v32 = vpop.f32.mrf.mxu1 }
 0x5f1   : > { %v719_v33 = vadd.f32 %v718_v32, %v694_v31 }
 0x5f3   : > { %v724_v34 = vmax.f32 %v719_v33, 0.0 }
 0x5f5   : > { %1000 = vmatmul.msk.f32.vlgmr.msrb.gmra.mxu2 %vm325_vm1, %v724_v34 }
 0x5f8   : > { %v721_v35 = vpop.f32.mrf.mxu1 }
 0x5f9   : > { %v722_v36 = vadd.f32 %v721_v35, %v694_v31 }
 0x5fb   : > { %v725_v37 = vmax.f32 %v722_v36, 0.0 }
 0x5fd   : > { %1001 = vmatmul.msk.f32.gmra.mxu2 %vm325_vm1, %v725_v37 }
 0x678   : > { %v755_v42 = vpop.f32.mrf.mxu2 }
 0x679   : > { %v756_v44 = vadd.f32 %v755_v42, %v731_v43 }
 0x67b   : > { %v761_v46 = vmax.f32 %v756_v44, 0.0 }
 0x67d   : > { %v763_v49 = vsel %vm325_vm1, %v761_v46, 0.0 }
 0x680   : > { %v758_v45 = vpop.f32.mrf.mxu2 }
 0x681   : > { %v759_v47 = vadd.f32 %v758_v45, %v731_v43 }
 0x683   : > { %v762_v48 = vmax.f32 %v759_v47, 0.0 }
 0x685   : > { %v764_v50 = vsel %vm325_vm1, %v762_v48, 0.0 }
 0x686   : > { %v765_v51 = vadd.f32 %v764_v50, %v763_v49 }
 0x688   : > { %v766_v52 = vrot.slane %v765_v51, 4 }
 0x68a   : > { %v767_v53 = vadd.f32 %v766_v52, %v765_v51 }
 0x68c   : > { %v768_v54 = vrot.slane %v767_v53, 2 }
 0x68e   : > { %v769_v55 = vadd.f32 %v768_v54, %v767_v53 }
 0x690   : > { %v770_v56 = vrot.slane %v769_v55, 1 }
 0x692   : > { %v771_v57 = vadd.f32 %v770_v56, %v769_v55 }
 0x694   : > { %1002 = vmatmul.msk.f32.vlgmr.msrb.gmra.mxu3 %vm325_vm1, %v771_v57 }
 0x717   : > { %v849_v60 = vpop.f32.mrf.mxu3 }
 0x718   : > { %v850_v61 = vadd.f32 %v849_v60, %v830_v59 }
 0x71a   : > { %852 = vst [vmem:[%s308_s17] sm:$0x1] %v850_v61 }
 0x71b   : > { %1201 = shalt.err (!%p1198_p8)
}
 0x71c   : > { %1021 = dma.vmem_to_hbm [thread:$0]  (%p1327_p5), %s865_s18, 16, %s867_s19, %s854_s20  }
 0x71d PF: > { %p1043_p9 = scmp.ge.s32.totalorder %s1244_s24, 2  ;;  %s878_s13 = sand.u32 1, %s1232_s21  }
 0x71e   : > { %s879_s12 = scalar_lea.sflag [#allocation4], %s878_s13 }
 0x71f   : > { %p1034_p10 = pnand %p1043_p9, %p1331_p6 }
 0x721   : > { %p1035_p11 = pneg %p1034_p10 }
 0x723   : > { %1227 = dma.done.wait (%p1035_p11), %s879_s12, 16  }
 0x724   : > { %1229 = vsyncadd (%p1035_p11), %s879_s12, 4294967280  ;;  %p18_p12 = scmp.ge.s32.totalorder %s1314_s27, 4   ;;  %s1507_s21 = smov %s1236_s22 }
 0x725   : > { %s1508_s22 = smov %s1240_s23  ;;  %s1509_s23 = smov %s1325_s30 }
 0x726   : > { %s1510_s24 = smov %s1314_s27  ;;  %20 = sbr.rel (!%p18_p12) target bundleno = 5 (0x5), region = 101 }
 0x72b   :  { %884 = vsyncpa [#allocation3], 1 }
 0x72c   :  { %886 = vsyncpa [#allocation3 + $0x1], 1 }
 0x72d   :  { %887 = vsyncpa [#allocation6], 1 }
 0x72e   :  { %888 = vsyncpa [#allocation4], 1 }
 0x72f   :  { %890 = vsyncpa [#allocation4 + $0x1], 1 }

</bundles_post_ra>
